<compile_context>
chip_gen: v6e
topology: v6e:2x2x1
jax: 0.10.0
libtpu: 0.0.40
codegen_flags: <defaults>
</compile_context>

<pallas_src>
import functools

import jax
import jax.numpy as jnp
from jax.experimental import pallas as pl
from jax.experimental.pallas import tpu as pltpu


LANE = 128          # points packed 128 per lane-row
MAX_ROW_TILE = 256  # 256 rows * 128 lanes = 32768 points (~384 KiB f32) / grid step


def _shading_kernel(specular, params_ref, *refs):
    # params_ref (SMEM, f32[16]):
    #   [0:3]   light direction (normalized)
    #   [3:6]   ambient_color
    #   [6:9]   diffuse_color
    #   [9:12]  specular_color
    #   [12:15] camera center
    #   [15]    shininess
    if specular:
        pts_ref, nrm_ref, rgb_ref, out_ref = refs
    else:
        nrm_ref, rgb_ref, out_ref = refs

    dx, dy, dz = params_ref[0], params_ref[1], params_ref[2]

    # Each channel slice is a full (row_tile, 128) tile (dense vregs).
    nX, nY, nZ = nrm_ref[0], nrm_ref[1], nrm_ref[2]

    cos_raw = nX * dx + nY * dy + nZ * dz          # dot(normal, light_dir)
    cos = jnp.maximum(cos_raw, 0.0)

    if specular:
        cx, cy, cz = params_ref[12], params_ref[13], params_ref[14]
        shininess = params_ref[15]
        pX, pY, pZ = pts_ref[0], pts_ref[1], pts_ref[2]

        vX, vY, vZ = cx - pX, cy - pY, cz - pZ      # camera_center - point
        inv_norm = jax.lax.rsqrt(vX * vX + vY * vY + vZ * vZ + 1e-12)
        vX, vY, vZ = vX * inv_norm, vY * inv_norm, vZ * inv_norm

        rX = 2.0 * cos_raw * nX - dx                # reflect direction
        rY = 2.0 * cos_raw * nY - dy
        rZ = 2.0 * cos_raw * nZ - dz

        alpha = jnp.maximum(vX * rX + vY * rY + vZ * rZ, 0.0)
        alpha = jnp.where(cos_raw > 0.0, alpha, 0.0)

        # alpha ** shininess via exp/log on the EUP (free bundle slot).
        # alpha == 0 handled explicitly so that shininess == 0 still gives
        # 1.0 (matches torch 0 ** 0 == 1).
        zero_pow = jnp.where(shininess == 0.0, 1.0, 0.0)
        spec_scale = jnp.where(
            alpha > 0.0,
            jnp.exp(shininess * jnp.log(jnp.maximum(alpha, 1e-30))),
            zero_pow,
        )

    for c in range(3):
        amb_c = params_ref[3 + c]
        dif_c = params_ref[6 + c]
        shaded = rgb_ref[c] * (amb_c + dif_c * cos)
        if specular:
            shaded = shaded + params_ref[9 + c] * spec_scale
        out_ref[c] = jnp.clip(shaded, 0.0, 1.0)


def _pick_row_tile(n_rows: int) -> int:
    """Largest row tile <= MAX_ROW_TILE that is a multiple of 8 and divides
    n_rows (or the full extent, which is always a legal block), preferring
    >= 2 grid steps so both v7x TensorCores get work."""
    if n_rows <= 8:
        return n_rows
    best = 0
    for cand in range(8, min(MAX_ROW_TILE, n_rows) + 1, 8):
        if n_rows % cand == 0:
            best = cand
    if best == 0:
        return n_rows  # full extent (single step); always legal
    if best == n_rows and n_rows >= 16:
        for cand in range(8 * (n_rows // 2 // 8), 7, -8):
            if n_rows % cand == 0:
                return cand
    return best


@functools.partial(jax.jit, static_argnames=("specular",))
def surface_splatting_shade_cm(points_cm, normals_cm, rgb_cm, params, *,
                               specular=False):
    """Channel-major shading.

    points_cm/normals_cm/rgb_cm: f32[3, R, 128]  (points packed 128 per row)
    params:                      f32[16]         (see kernel docstring)
    Returns shaded rgb, f32[3, R, 128].
    """
    _, n_rows, lane = normals_cm.shape
    assert lane == LANE
    row_tile = _pick_row_tile(n_rows)
    grid = (pl.cdiv(n_rows, row_tile),)

    data_spec = pl.BlockSpec((3, row_tile, LANE), lambda i: (0, i, 0))

    if specular:
        inputs = (params, points_cm, normals_cm, rgb_cm)
    else:
        # Points are only needed for the specular view vector; skip their DMA.
        inputs = (params, normals_cm, rgb_cm)
    in_specs = [pl.BlockSpec(memory_space=pltpu.SMEM)] + \
               [data_spec] * (len(inputs) - 1)

    return pl.pallas_call(
        functools.partial(_shading_kernel, specular),
        out_shape=jax.ShapeDtypeStruct((3, n_rows, LANE), jnp.float32),
        grid=grid,
        in_specs=in_specs,
        out_specs=data_spec,
        compiler_params=pltpu.CompilerParams(
            dimension_semantics=("parallel",)),
    )(*inputs)


# --- (P, 3) <-> channel-major helpers (boundary only; see TODO at top) -------

def to_channel_major(x):
    """(P, 3) -> (3, ceil(P/128), 128) f32, zero-padded along P."""
    P = x.shape[0]
    pad = (-P) % LANE
    if pad:
        x = jnp.concatenate([x, jnp.zeros((pad, 3), x.dtype)], axis=0)
    return x.T.reshape(3, -1, LANE).astype(jnp.float32)


def from_channel_major(x_cm, n_points):
    """(3, R, 128) -> (P, 3)."""
    return x_cm.reshape(3, -1).T[:n_points]


def surface_splatting_shade(points, normals, rgb, params, *, specular=False):
    """(P, 3)-layout convenience wrapper around the channel-major kernel."""
    P = points.shape[0]
    out_cm = surface_splatting_shade_cm(
        to_channel_major(points), to_channel_major(normals),
        to_channel_major(rgb), params, specular=specular)
    return from_channel_major(out_cm, P)


def make_params(light_dir, ambient, diffuse, specular_color, cam_center,
                shininess):
    light_dir = jnp.asarray(light_dir, jnp.float32)
    light_dir = light_dir / jnp.linalg.norm(light_dir)
    return jnp.concatenate([
        light_dir,
        jnp.asarray(ambient, jnp.float32),
        jnp.asarray(diffuse, jnp.float32),
        jnp.asarray(specular_color, jnp.float32),
        jnp.asarray(cam_center, jnp.float32),
        jnp.asarray([float(shininess)], jnp.float32),
    ])


def _reference_shade(points, normals, rgb, params, *, specular=False):
    """Pure-JAX reference (mirrors apply_lighting + shading in the module)."""
    d = params[0:3]
    amb = params[3:6]
    dif = params[6:9]
    spc = params[9:12]
    cam = params[12:15]
    shin = params[15]
    cos_raw = jnp.sum(normals * d, axis=-1, keepdims=True)
    cos = jnp.maximum(cos_raw, 0.0)
    diffuse = dif * cos
    specular_col = jnp.zeros((1, 3), jnp.float32)
    if specular:
        view = cam - points
        view = view / jnp.sqrt(jnp.sum(view * view, axis=-1, keepdims=True) + 1e-12)
        reflect = -d + 2.0 * cos_raw * normals
        alpha = jnp.maximum(jnp.sum(view * reflect, axis=-1, keepdims=True), 0.0)
        alpha = alpha * (cos_raw > 0.0)
        specular_col = spc * (alpha ** shin)
    return jnp.clip(rgb * (amb + diffuse) + specular_col, 0.0, 1.0)


if __name__ == "__main__":
    key = jax.random.PRNGKey(0)
    P = 2048  # packed points across the point-cloud batch (small demo shape)

    k1, k2, k3 = jax.random.split(key, 3)
    points = jax.random.normal(k1, (P, 3), jnp.float32) * 2.0
    normals = jax.random.normal(k2, (P, 3), jnp.float32)
    normals = normals / jnp.linalg.norm(normals, axis=-1, keepdims=True)
    rgb = jax.random.uniform(k3, (P, 3), jnp.float32)  # features_packed()[:, :3]

    # Deterministic "lights" / "cameras" (DirectionalLights-style).
    # TODO(synk): per-cloud gather_props (heterogeneous lights/cameras per
    #             point) is host-side bookkeeping; one light/camera used here.
    params = make_params(
        light_dir=[0.0, 1.0, 0.5], ambient=[0.5, 0.5, 0.5],
        diffuse=[0.3, 0.3, 0.3], specular_color=[0.2, 0.2, 0.2],
        cam_center=[0.0, 0.0, 5.0], shininess=64.0)

    # Default forward path: specular=False.
    out0 = surface_splatting_shade(points, normals, rgb, params, specular=False)
    jax.block_until_ready(out0)

    # Full path with specular enabled.
    out1 = surface_splatting_shade(points, normals, rgb, params, specular=True)
    jax.block_until_ready(out1)

    ref0 = _reference_shade(points, normals, rgb, params, specular=False)
    ref1 = _reference_shade(points, normals, rgb, params, specular=True)
    assert out0.shape == (P, 3) and out0.dtype == jnp.float32
    assert out1.shape == (P, 3) and out1.dtype == jnp.float32
    assert jnp.allclose(out0, ref0, atol=1e-5), "specular=False mismatch"
    assert jnp.allclose(out1, ref1, atol=1e-5), "specular=True mismatch"
    assert float(out1.min()) >= 0.0 and float(out1.max()) <= 1.0

    print("KERNEL_OK")
</pallas_src>

<mosaic_0001>
module attributes {stable_mosaic.version = 11 : i64} {
  func.func @_shading_kernel(%arg0: i32, %arg1: memref<16xf32, #tpu.memory_space<smem>>, %arg2: memref<3x8x128xf32, #tpu.memory_space<vmem>>, %arg3: memref<3x8x128xf32, #tpu.memory_space<vmem>>, %arg4: memref<3x8x128xf32, #tpu.memory_space<vmem>>) attributes {dimension_semantics = [#tpu.dimension_semantics<parallel>], iteration_bounds = array<i64: 2>, scalar_prefetch = 0 : i64, scratch_operands = 0 : i64, tpu.core_type = #tpu.core_type<tc>, window_params = [{transform_indices = @transform_0, window_bounds = array<i64: 16>}, {transform_indices = @transform_1, window_bounds = array<i64: 3, 8, 128>}, {transform_indices = @transform_2, window_bounds = array<i64: 3, 8, 128>}, {transform_indices = @transform_3, window_bounds = array<i64: 3, 8, 128>}]} {
    %c0 = arith.constant 0 : index
    %0 = memref.load %arg1[%c0] : memref<16xf32, #tpu.memory_space<smem>>
    %c1 = arith.constant 1 : index
    %1 = memref.load %arg1[%c1] : memref<16xf32, #tpu.memory_space<smem>>
    %c2 = arith.constant 2 : index
    %2 = memref.load %arg1[%c2] : memref<16xf32, #tpu.memory_space<smem>>
    %c0_0 = arith.constant 0 : index
    %c0_1 = arith.constant 0 : index
    %c0_2 = arith.constant 0 : index
    %3 = vector.load %arg2[%c0_0, %c0_1, %c0_2] : memref<3x8x128xf32, #tpu.memory_space<vmem>>, vector<1x8x128xf32>
    %4 = vector.shape_cast %3 : vector<1x8x128xf32> to vector<8x128xf32>
    %c1_3 = arith.constant 1 : index
    %c0_4 = arith.constant 0 : index
    %c0_5 = arith.constant 0 : index
    %5 = vector.load %arg2[%c1_3, %c0_4, %c0_5] : memref<3x8x128xf32, #tpu.memory_space<vmem>>, vector<1x8x128xf32>
    %6 = vector.shape_cast %5 : vector<1x8x128xf32> to vector<8x128xf32>
    %c2_6 = arith.constant 2 : index
    %c0_7 = arith.constant 0 : index
    %c0_8 = arith.constant 0 : index
    %7 = vector.load %arg2[%c2_6, %c0_7, %c0_8] : memref<3x8x128xf32, #tpu.memory_space<vmem>>, vector<1x8x128xf32>
    %8 = vector.shape_cast %7 : vector<1x8x128xf32> to vector<8x128xf32>
    %9 = vector.broadcast %0 : f32 to vector<8x128xf32>
    %10 = arith.mulf %4, %9 : vector<8x128xf32>
    %11 = vector.broadcast %1 : f32 to vector<8x128xf32>
    %12 = arith.mulf %6, %11 : vector<8x128xf32>
    %13 = arith.addf %10, %12 : vector<8x128xf32>
    %14 = vector.broadcast %2 : f32 to vector<8x128xf32>
    %15 = arith.mulf %8, %14 : vector<8x128xf32>
    %16 = arith.addf %13, %15 : vector<8x128xf32>
    %cst = arith.constant 0.000000e+00 : f32
    %17 = vector.broadcast %cst : f32 to vector<8x128xf32>
    %18 = arith.maximumf %16, %17 : vector<8x128xf32>
    %c3 = arith.constant 3 : index
    %19 = memref.load %arg1[%c3] : memref<16xf32, #tpu.memory_space<smem>>
    %c6 = arith.constant 6 : index
    %20 = memref.load %arg1[%c6] : memref<16xf32, #tpu.memory_space<smem>>
    %c0_9 = arith.constant 0 : index
    %c0_10 = arith.constant 0 : index
    %c0_11 = arith.constant 0 : index
    %21 = vector.load %arg3[%c0_9, %c0_10, %c0_11] : memref<3x8x128xf32, #tpu.memory_space<vmem>>, vector<1x8x128xf32>
    %22 = vector.shape_cast %21 : vector<1x8x128xf32> to vector<8x128xf32>
    %23 = vector.broadcast %20 : f32 to vector<8x128xf32>
    %24 = arith.mulf %23, %18 : vector<8x128xf32>
    %25 = vector.broadcast %19 : f32 to vector<8x128xf32>
    %26 = arith.addf %25, %24 : vector<8x128xf32>
    %27 = arith.mulf %22, %26 : vector<8x128xf32>
    %cst_12 = arith.constant 0.000000e+00 : f32
    %cst_13 = arith.constant 1.000000e+00 : f32
    %28 = vector.broadcast %cst_12 : f32 to vector<8x128xf32>
    %29 = arith.maximumf %28, %27 : vector<8x128xf32>
    %30 = vector.broadcast %cst_13 : f32 to vector<8x128xf32>
    %31 = arith.minimumf %30, %29 : vector<8x128xf32>
    %c0_14 = arith.constant 0 : index
    %c0_15 = arith.constant 0 : index
    %c0_16 = arith.constant 0 : index
    %32 = vector.load %arg4[%c0_14, %c0_15, %c0_16] : memref<3x8x128xf32, #tpu.memory_space<vmem>>, vector<1x8x128xf32>
    %33 = vector.shape_cast %32 : vector<1x8x128xf32> to vector<8x128xf32>
    %34 = vector.shape_cast %31 : vector<8x128xf32> to vector<1x8x128xf32>
    tpu.vector_store %arg4[%c0_14, %c0_15, %c0_16], %34 {strides = array<i32>} : memref<3x8x128xf32, #tpu.memory_space<vmem>>, vector<1x8x128xf32>,
    %c4 = arith.constant 4 : index
    %35 = memref.load %arg1[%c4] : memref<16xf32, #tpu.memory_space<smem>>
    %c7 = arith.constant 7 : index
    %36 = memref.load %arg1[%c7] : memref<16xf32, #tpu.memory_space<smem>>
    %c1_17 = arith.constant 1 : index
    %c0_18 = arith.constant 0 : index
    %c0_19 = arith.constant 0 : index
    %37 = vector.load %arg3[%c1_17, %c0_18, %c0_19] : memref<3x8x128xf32, #tpu.memory_space<vmem>>, vector<1x8x128xf32>
    %38 = vector.shape_cast %37 : vector<1x8x128xf32> to vector<8x128xf32>
    %39 = vector.broadcast %36 : f32 to vector<8x128xf32>
    %40 = arith.mulf %39, %18 : vector<8x128xf32>
    %41 = vector.broadcast %35 : f32 to vector<8x128xf32>
    %42 = arith.addf %41, %40 : vector<8x128xf32>
    %43 = arith.mulf %38, %42 : vector<8x128xf32>
    %cst_20 = arith.constant 0.000000e+00 : f32
    %cst_21 = arith.constant 1.000000e+00 : f32
    %44 = vector.broadcast %cst_20 : f32 to vector<8x128xf32>
    %45 = arith.maximumf %44, %43 : vector<8x128xf32>
    %46 = vector.broadcast %cst_21 : f32 to vector<8x128xf32>
    %47 = arith.minimumf %46, %45 : vector<8x128xf32>
    %c1_22 = arith.constant 1 : index
    %c0_23 = arith.constant 0 : index
    %c0_24 = arith.constant 0 : index
    %48 = vector.load %arg4[%c1_22, %c0_23, %c0_24] : memref<3x8x128xf32, #tpu.memory_space<vmem>>, vector<1x8x128xf32>
    %49 = vector.shape_cast %48 : vector<1x8x128xf32> to vector<8x128xf32>
    %50 = vector.shape_cast %47 : vector<8x128xf32> to vector<1x8x128xf32>
    tpu.vector_store %arg4[%c1_22, %c0_23, %c0_24], %50 {strides = array<i32>} : memref<3x8x128xf32, #tpu.memory_space<vmem>>, vector<1x8x128xf32>,
    %c5 = arith.constant 5 : index
    %51 = memref.load %arg1[%c5] : memref<16xf32, #tpu.memory_space<smem>>
    %c8 = arith.constant 8 : index
    %52 = memref.load %arg1[%c8] : memref<16xf32, #tpu.memory_space<smem>>
    %c2_25 = arith.constant 2 : index
    %c0_26 = arith.constant 0 : index
    %c0_27 = arith.constant 0 : index
    %53 = vector.load %arg3[%c2_25, %c0_26, %c0_27] : memref<3x8x128xf32, #tpu.memory_space<vmem>>, vector<1x8x128xf32>
    %54 = vector.shape_cast %53 : vector<1x8x128xf32> to vector<8x128xf32>
    %55 = vector.broadcast %52 : f32 to vector<8x128xf32>
    %56 = arith.mulf %55, %18 : vector<8x128xf32>
    %57 = vector.broadcast %51 : f32 to vector<8x128xf32>
    %58 = arith.addf %57, %56 : vector<8x128xf32>
    %59 = arith.mulf %54, %58 : vector<8x128xf32>
    %cst_28 = arith.constant 0.000000e+00 : f32
    %cst_29 = arith.constant 1.000000e+00 : f32
    %60 = vector.broadcast %cst_28 : f32 to vector<8x128xf32>
    %61 = arith.maximumf %60, %59 : vector<8x128xf32>
    %62 = vector.broadcast %cst_29 : f32 to vector<8x128xf32>
    %63 = arith.minimumf %62, %61 : vector<8x128xf32>
    %c2_30 = arith.constant 2 : index
    %c0_31 = arith.constant 0 : index
    %c0_32 = arith.constant 0 : index
    %64 = vector.load %arg4[%c2_30, %c0_31, %c0_32] : memref<3x8x128xf32, #tpu.memory_space<vmem>>, vector<1x8x128xf32>
    %65 = vector.shape_cast %64 : vector<1x8x128xf32> to vector<8x128xf32>
    %66 = vector.shape_cast %63 : vector<8x128xf32> to vector<1x8x128xf32>
    tpu.vector_store %arg4[%c2_30, %c0_31, %c0_32], %66 {strides = array<i32>} : memref<3x8x128xf32, #tpu.memory_space<vmem>>, vector<1x8x128xf32>,
    return
  }
  func.func @transform_0(%arg0: i32) -> i32 {
    %c0_i32 = arith.constant 0 : i32
    %c0_i32_0 = arith.constant 0 : i32
    return %c0_i32 : i32
  }
  func.func @transform_1(%arg0: i32) -> (i32, i32, i32) {
    %c0_i32 = arith.constant 0 : i32
    %c0_i32_0 = arith.constant 0 : i32
    %c0_i32_1 = arith.constant 0 : i32
    return %c0_i32, %arg0, %c0_i32_0 : i32, i32, i32
  }
  func.func @transform_2(%arg0: i32) -> (i32, i32, i32) {
    %c0_i32 = arith.constant 0 : i32
    %c0_i32_0 = arith.constant 0 : i32
    %c0_i32_1 = arith.constant 0 : i32
    return %c0_i32, %arg0, %c0_i32_0 : i32, i32, i32
  }
  func.func @transform_3(%arg0: i32) -> (i32, i32, i32) {
    %c0_i32 = arith.constant 0 : i32
    %c0_i32_0 = arith.constant 0 : i32
    %c0_i32_1 = arith.constant 0 : i32
    return %c0_i32, %arg0, %c0_i32_0 : i32, i32, i32
  }
}

</mosaic_0001>

<bundles_post_ra>
// kernel: surface_splatting_shade_cm.1
= control target key start
LH: loop header
LB: loop body
LE: loop exit
PB: predicated region body
PF: predicated region fallthrough
CT: control target
= control target key end

     0   :  { %s939_s0 = inlined_call_operand.vmem [shape: f32[16], index: 0, kind: input, shape index: {}]   ;;  %s940_s1 = inlined_call_operand.hbm [shape: f32[3,16,128], index: 1, kind: input, shape index: {}]   ;;  %s941_s2 = inlined_call_operand.hbm [shape: f32[3,16,128], index: 2, kind: input, shape index: {}]   ;;  %s942_s3 = inlined_call_operand.hbm [shape: f32[3,16,128], index: 3, kind: output, shape index: {}]  }
   0x1   :  { %946 = sst [smem:[#allocation14_spill]] %s939_s0 }
   0x2   :  { %8 = vsyncpa [#allocation5], 0 }
   0x3   :  { %9 = vsyncpa [#allocation3], 0 }
   0x4   :  { %11 = vsyncpa [#allocation3 + $0x1], 0 }
   0x5   :  { %12 = vsyncpa [#allocation8], 0 }
   0x6   :  { %14 = vsyncpa [#allocation8 + $0x1], 0 }
   0x7   :  { %15 = vsyncpa [#allocation4], 0 }
   0x8   :  { %17 = vsyncpa [#allocation4 + $0x1], 0  ;;  %s687_s12 = smov 0   ;;  %s689_s13 = smov 0  }
   0x9   :  { %s691_s14 = smov 0   ;;  %s693_s15 = smov 0  }
   0xa LB: > { %s708_s16 = sadd.s32 4294967295, %s655_s15   ;;  %s416_s17 = sadd.s32 4294967294, %s655_s15   ;;  %s655_s15 = sphi %s693_s15, %s964_s15   ;;  %s651_s14 = sphi %s691_s14, %s963_s14   ;;  %s647_s13 = sphi %s689_s13, %s962_s13   ;;  %s643_s12 = sphi %s687_s12, %s961_s12  }
   0xb   : > { %s712_s18 = sadd.s32 1, %s655_s15   ;;  %s51_s19 = sadd.s32 1, %s651_s14 }
   0xc   : > { %s48_s20 = ssub.s32 %s655_s15, %s712_s18  ;;  %p58_p0 = scmp.ne.s32.totalorder %s651_s14, %s647_s13 }
   0xd   : > { %p49_p1 = scmp.eq.s32.totalorder %s48_s20, 0  ;;  %p59_p2 = scmp.eq.s32.totalorder %s655_s15, 0 }
   0xe   : > { %p64_p3 = scmp.ne.s32.totalorder %s647_s13, %s643_s12  ;;  %p943_p4 = scmp.eq.s32.totalorder %s708_s16, 0 }
   0xf   : > { %s724_s21 = scalar_select %p49_p1, %s651_s14, %s51_s19  }
  0x10   : > { %p726_p5 = por %p59_p2, %p58_p0  ;;  %p732_p6 = por %p943_p4, %p64_p3 }
  0x11   : > { %p114_p7 = scmp.eq.s32.totalorder %s708_s16, 1  ;;  %p120_p8 = scmp.eq.s32.totalorder %s416_s17, 1 }
  0x12   : > { %s948_s23 = scalar_select %p732_p6, 1, 0 }
  0x13   : > { %p417_p9 = scmp.ge.s32.totalorder %s655_s15, 1  ;;  %p127_p10 = scmp.lt.s32.totalorder %s655_s15, 3 }
  0x14   : > { %p739_p11 = por %p114_p7, %p58_p0  ;;  %p743_p12 = por %p120_p8, %p64_p3 }
  0x15   : > { %p747_p13 = pnand %p417_p9, %p127_p10  ;;  %s952_s0 = sld [smem:[#allocation14_spill]] }
  0x16   : > { %s949_s24 = scalar_select %p739_p11, 1, 0 }
  0x17   : > { %s950_s25 = scalar_select %p743_p12, 1, 0 }
  0x18   : > { %p454_p1 = pneg %p747_p13  ;;  %p470_p2 = scmp.lt.s32.totalorder %s655_s15, 2 }
  0x19   : > { %s765_s4 = sand.u32 1, %s651_s14  }
  0x1a   : > { %p760_p7 = pnand %p454_p1, %p943_p4  ;;  %p769_p3 = pnand %p470_p2, %p726_p5 }
  0x1b   : > { %s140_s29 = sshll.u32 %s952_s0, 4  ;;  %s441_s6 = smul.u32 24, %s765_s4  ;;  %s141_s29 = int_to_ptr.vmem [resolvable:$true] %s140_s29 }
  0x1c   : > { %s512_s7 = scalar_lea.vmem %s141_s29, 16  ;;  %p514_p9 = pneg %p760_p7 }
  0x1d   : > { %p513_p8 = scmp.ne.s32.totalorder %s141_s29, %s512_s7  ;;  %p520_p1 = scmp.lt.s32.totalorder %s141_s29, %s141_s29 }
  0x1e   : > { %p521_p4 = scmp.lt.s32.totalorder %s512_s7, %s512_s7 }
  0x1f   : > { %p515_p10 = pnand %p514_p9, %p513_p8 }
  0x20   : > { %p522_p12 = por %p521_p4, %p520_p1 }
  0x21   : > { %p516_p0 = pneg %p515_p10 }
  0x23   : > { %p523_p11 = pnand %p522_p12, %p516_p0 }
  0x25   : > { %526 = shalt.err (!%p523_p11)
}
  0x26   : > { %s657_s8 = smov [#allocation2]   ;;  %s420_s9 = sshll.u32 %s655_s15, 7 }
  0x27   : > { %457 = dma.vmem_to_smem (!%p760_p7), %s141_s29, 16, %s657_s8, [#allocation5]  }
  0x28   : > { %s155_s10 = scalar_lea.vmem [#allocation6], %s441_s6  ;;  %s786_s20 = scalar_lea.hbm %s940_s1, %s420_s9 }
  0x29   : > { %s161_s11 = sshll.u32 %s155_s10, 4  ;;  %s152_s22 = scalar_lea.sflag [#allocation3], %s765_s4  ;;  %s788_s11 = int_to_ptr.vmem [resolvable:$true] %s161_s11 }
  0x2a   : > { %s527_s27 = scalar_lea.hbm %s786_s20, 384  ;;  %p529_p5 = pneg %p769_p3 }
  0x2b   : > { %p528_p4 = scmp.ne.s32.totalorder %s786_s20, %s527_s27  ;;  %s532_s30 = scalar_lea.hbm %s940_s1, 768 }
  0x2c   : > { %p533_p0 = scmp.lt.s32.totalorder %s786_s20, %s940_s1  ;;  %p534_p2 = scmp.lt.s32.totalorder %s532_s30, %s527_s27 }
  0x2d   : > { %p530_p11 = pnand %p529_p5, %p528_p4 }
  0x2e   : > { %p535_p7 = por %p534_p2, %p533_p0 }
  0x2f   : > { %p531_p12 = pneg %p530_p11 }
  0x31   : > { %p536_p8 = pnand %p535_p7, %p531_p12 }
  0x33   : > { %539 = shalt.err (!%p536_p8)
}
  0x34   : > { %s540_s10 = scalar_lea.vmem %s788_s11, 384  ;;  %s658_s17 = smov [#allocation6]  }
  0x35   : > { %p541_p9 = scmp.ne.s32.totalorder %s788_s11, %s540_s10  ;;  %s545_s19 = sshll.u32 %s658_s17, 4  ;;  %s546_s19 = int_to_ptr.vmem [resolvable:$false] %s545_s19 }
  0x36   : > { %s547_s28 = scalar_lea.vmem %s546_s19, 768  ;;  %p548_p4 = scmp.lt.s32.totalorder %s788_s11, %s546_s19 }
  0x37   : > { %p543_p10 = pnand %p541_p9, %p529_p5  ;;  %p549_p11 = scmp.lt.s32.totalorder %s547_s28, %s540_s10 }
  0x39   : > { %p544_p1 = pneg %p543_p10  ;;  %p550_p6 = por %p549_p11, %p548_p4 }
  0x3b   : > { %p551_p0 = pnand %p550_p6, %p544_p1 }
  0x3d   : > { %554 = shalt.err (!%p551_p0)
}
  0x3e   : > { %s659_s27 = smov 256   ;;  %s660_s29 = smov 128  }
  0x3f   : > { %s661_s30 = smov 8   ;;  %s825_s10 = scalar_lea.hbm %s941_s2, %s420_s9 }
  0x40   : > { %461 = dma.hbm_to_vmem [thread:$0]  (!%p769_p3), %s786_s20, 384, %s788_s11, %s152_s22, %s659_s27, %s660_s29, %s661_s30  }
  0x41   : > { %s175_s17 = scalar_lea.vmem [#allocation7], %s441_s6  ;;  %s172_s28 = scalar_lea.sflag [#allocation8], %s765_s4 }
  0x42   : > { %s181_s19 = sshll.u32 %s175_s17, 4  ;;  %s555_s0 = scalar_lea.hbm %s825_s10, 384  ;;  %s829_s19 = int_to_ptr.vmem [resolvable:$true] %s181_s19 }
  0x43   : > { %p556_p6 = scmp.ne.s32.totalorder %s825_s10, %s555_s0  ;;  %s560_s9 = scalar_lea.hbm %s941_s2, 768 }
  0x44   : > { %p561_p7 = scmp.lt.s32.totalorder %s825_s10, %s941_s2  ;;  %p562_p8 = scmp.lt.s32.totalorder %s560_s9, %s555_s0 }
  0x45   : > { %p558_p12 = pnand %p556_p6, %p529_p5 }
  0x46   : > { %p563_p9 = por %p562_p8, %p561_p7 }
  0x47   : > { %p559_p2 = pneg %p558_p12 }
  0x49   : > { %p564_p10 = pnand %p563_p9, %p559_p2 }
  0x4b   : > { %567 = shalt.err (!%p564_p10)
}
  0x4c   : > { %s568_s4 = scalar_lea.vmem %s829_s19, 384  ;;  %s662_s6 = smov [#allocation7]  }
  0x4d   : > { %p569_p1 = scmp.ne.s32.totalorder %s829_s19, %s568_s4  ;;  %s573_s8 = sshll.u32 %s662_s6, 4  ;;  %s574_s8 = int_to_ptr.vmem [resolvable:$false] %s573_s8 }
  0x4e   : > { %s575_s17 = scalar_lea.vmem %s574_s8, 768  ;;  %p576_p0 = scmp.lt.s32.totalorder %s829_s19, %s574_s8 }
  0x4f   : > { %p571_p4 = pnand %p569_p1, %p529_p5  ;;  %p577_p6 = scmp.lt.s32.totalorder %s575_s17, %s568_s4 }
  0x51   : > { %p572_p11 = pneg %p571_p4  ;;  %p578_p12 = por %p577_p6, %p576_p0 }
  0x53   : > { %p579_p7 = pnand %p578_p12, %p572_p11 }
  0x55   : > { %582 = shalt.err (!%p579_p7)
}
  0x56   : > { %464 = dma.hbm_to_vmem [thread:$0]  (!%p769_p3), %s825_s10, 384, %s829_s19, %s172_s28, %s659_s27, %s660_s29, %s661_s30  }
  0x57   : > { %193 = sbr.rel (%p747_p13) target bundleno = 144 (0x90), region = 32  ;;  %p955_p5 = scmp.eq.s32.totalorder (!%p747_p13), %s708_s16, 0 }
  0x5c   : > { %626 = dma.done.wait (%p955_p5), [#allocation5], 16   ;;  %p956_p2 = pmov %p955_p5 }
  0x5d   : > { %s864_s0 = sand.u32 1, %s647_s13   ;;  %p957_p3 = scmp.ne.s32.totalorder %s948_s23, 0 }
  0x5e   : > { %628 = vsyncadd (%p956_p2), [#allocation5], 4294967280  ;;  %s867_s5 = smul.u32 24, %s864_s0  ;;  %s200_s11 = scalar_lea.sflag [#allocation3], %s864_s0 }
  0x60   : > { %s203_s27 = scalar_lea.vmem [#allocation6], %s867_s5 }
  0x61   : > { %630 = dma.done.wait (%p957_p3), %s200_s11, 384  }
  0x62   : > { %632 = vsyncadd (%p957_p3), %s200_s11, 4294966912  ;;  %s209_s26 = scalar_lea.sflag [#allocation8], %s864_s0  ;;  %s877_s29 = scalar_lea.vmem [#allocation7], %s867_s5 }
  0x63   : > { %634 = dma.done.wait (%p957_p3), %s209_s26, 384  }
  0x64   : > { %636 = vsyncadd (%p957_p3), %s209_s26, 4294966912 }
  0x65   : > { %217 = sfence }
  0x66   : > { %s241_s30 = sld [smem:[#allocation2]]  ;;  %v244_v0 = vld [vmem:[%s203_s27] sm:$0xff]  ;;  %v426_v1 = vld [vmem:[%s203_s27 + $0x8] sm:$0xff]  ;;  %v427_v2 = vld [vmem:[%s203_s27 + $0x10] sm:$0xff]  ;;  %s240_s4 = scalar_lea.vmem [#allocation9], %s867_s5 }
  0x67   : > { %s424_s10 = sld [smem:[#allocation2 + $0x1]]  ;;  %v260_v21 = vld [vmem:[%s877_s29] sm:$0xff]  ;;  %v432_v22 = vld [vmem:[%s877_s29 + $0x8] sm:$0xff]  ;;  %v436_v23 = vld [vmem:[%s877_s29 + $0x10] sm:$0xff]  ;;  %s308_s6 = sshll.u32 %s240_s4, 4  ;;  %s891_s6 = int_to_ptr.vmem [resolvable:$true] %s308_s6 }
  0x68   : > { %s425_s19 = sld [smem:[#allocation2 + $0x2]]  ;;  %s438_s8 = sshll.u32 %s708_s16, 7 }
  0x69   : > { %s883_s28 = sld [smem:[#allocation2 + $0x3]]  ;;  %s896_s27 = scalar_lea.hbm %s942_s3, %s438_s8 }
  0x6a   : > { %s429_s20 = sld [smem:[#allocation2 + $0x6]]  ;;  %s296_s16 = scalar_lea.sflag [#allocation4], %s864_s0 }
  0x6b   : > { %s430_s9 = sld [smem:[#allocation2 + $0x4]]  ;;  %s583_s5 = scalar_lea.vmem %s891_s6, 384 }
  0x6c   : > { %v249_v3 = vstv %s241_s30  ;;  %s431_s22 = sld [smem:[#allocation2 + $0x7]]  ;;  %p584_p13 = scmp.ne.s32.totalorder %s891_s6, %s583_s5 }
  0x6d   : > { %v250_v4 = vmul.f32 %v249_v3, %v244_v0  ;;  %v251_v5 = vstv %s424_s10  ;;  %s434_s7 = sld [smem:[#allocation2 + $0x5]]  ;;  %p958_p8 = scmp.ne.s32.totalorder %s949_s24, 0 }
  0x6e   : > { %v252_v6 = vmul.f32 %v426_v1, %v251_v5  ;;  %v254_v7 = vstv %s425_s19  ;;  %s435_s23 = sld [smem:[#allocation2 + $0x8]]  ;;  %s663_s26 = smov [#allocation9]  }
  0x6f   : > { %v255_v8 = vmul.f32 %v427_v2, %v254_v7  ;;  %v263_v15 = vstv %s883_s28  ;;  %p585_p9 = pnand %p584_p13, %p958_p8  ;;  %s587_s29 = sshll.u32 %s663_s26, 4  ;;  %s588_s29 = int_to_ptr.vmem [resolvable:$false] %s587_s29 }
  0x70   : > { %v253_v9 = vadd.f32 %v252_v6, %v250_v4  ;;  %v261_v11 = vstv %s429_s20  ;;  %s589_s30 = scalar_lea.vmem %s588_s29, 768  ;;  %p590_p1 = scmp.lt.s32.totalorder %s891_s6, %s588_s29 }
  0x71   : > { %v275_v16 = vstv %s430_s9  ;;  %p586_p10 = pneg %p585_p9  ;;  %p591_p4 = scmp.lt.s32.totalorder %s589_s30, %s583_s5 }
  0x72   : > { %v256_v10 = vadd.f32 %v255_v8, %v253_v9  ;;  %v273_v12 = vstv %s431_s22 }
  0x73   : > { %v288_v17 = vstv %s434_s7  ;;  %p592_p11 = por %p591_p4, %p590_p1 }
  0x74   : > { %v257_v13 = vmax.f32 %v256_v10, 0.0  ;;  %v286_v14 = vstv %s435_s23 }
  0x75   : > { %p593_p0 = pnand %p592_p11, %p586_p10 }
  0x76   : > { %v262_v18 = vmul.f32 %v261_v11, %v257_v13  ;;  %v274_v19 = vmul.f32 %v273_v12, %v257_v13  ;;  %v287_v20 = vmul.f32 %v286_v14, %v257_v13 }
  0x78   : > { %v264_v24 = vadd.f32 %v263_v15, %v262_v18  ;;  %v276_v25 = vadd.f32 %v275_v16, %v274_v19  ;;  %v289_v26 = vadd.f32 %v288_v17, %v287_v20 }
  0x7a   : > { %v265_v27 = vmul.f32 %v264_v24, %v260_v21  ;;  %v277_v28 = vmul.f32 %v432_v22, %v276_v25  ;;  %v290_v29 = vmul.f32 %v436_v23, %v289_v26 }
  0x7c   : > { %v266_v30 = vmax.f32 %v265_v27, 0.0  ;;  %v278_v31 = vmax.f32 %v277_v28, 0.0  ;;  %v291_v32 = vmax.f32 %v290_v29, 0.0 }
  0x7e   : > { %v267_v33 = vmin.f32 %v266_v30, 1.0  ;;  %v279_v34 = vmin.f32 %v278_v31, 1.0  ;;  %v292_v35 = vmin.f32 %v291_v32, 1.0 }
  0x80   : > { %268 = vst [vmem:[%s240_s4] sm:$0xff] %v267_v33  ;;  %433 = vst [vmem:[%s240_s4 + $0x8] sm:$0xff] %v279_v34 }
  0x81   : > { %437 = vst [vmem:[%s240_s4 + $0x10] sm:$0xff] %v292_v35 }
  0x82   : > { %596 = shalt.err (!%p593_p0)
}
  0x83   : > { %s597_s10 = scalar_lea.hbm %s896_s27, 384  ;;  %s601_s20 = scalar_lea.hbm %s942_s3, 768 }
  0x84   : > { %p598_p6 = scmp.ne.s32.totalorder %s896_s27, %s597_s10  ;;  %p602_p5 = scmp.lt.s32.totalorder %s896_s27, %s942_s3 }
  0x85   : > { %p603_p2 = scmp.lt.s32.totalorder %s601_s20, %s597_s10 }
  0x86   : > { %p599_p12 = pnand %p598_p6, %p958_p8 }
  0x87   : > { %p604_p3 = por %p603_p2, %p602_p5 }
  0x88   : > { %p600_p7 = pneg %p599_p12 }
  0x8a   : > { %p605_p13 = pnand %p604_p3, %p600_p7 }
  0x8c   : > { %608 = shalt.err (!%p605_p13)
}
  0x8d   : > { %s664_s7 = smov 128   ;;  %s665_s23 = smov 256  }
  0x8e   : > { %s666_s4 = smov 8  }
  0x8f   : > { %452 = dma.vmem_to_hbm [thread:$0]  (%p958_p8), %s891_s6, 384, %s896_s27, %s296_s16, %s664_s7, %s665_s23, %s666_s4  }
  0x90 PF: > { %s323_s8 = sand.u32 1, %s643_s12   ;;  %p959_p9 = scmp.ne.s32.totalorder %s950_s25, 0 }
  0x91   : > { %p960_p10 = scmp.ge.s32.totalorder %s655_s15, 2  ;;  %s324_s17 = scalar_lea.sflag [#allocation4], %s323_s8 }
  0x93   : > { %p466_p1 = pnand %p960_p10, %p959_p9 }
  0x95   : > { %p467_p4 = pneg %p466_p1 }
  0x97   : > { %638 = dma.done.wait (%p467_p4), %s324_s17, 384  }
  0x98   : > { %640 = vsyncadd (%p467_p4), %s324_s17, 4294966912  ;;  %p20_p11 = scmp.ge.s32.totalorder %s712_s18, 4   ;;  %s961_s12 = smov %s647_s13 }
  0x99   : > { %s962_s13 = smov %s651_s14  ;;  %s963_s14 = smov %s724_s21 }
  0x9a   : > { %s964_s15 = smov %s712_s18  ;;  %22 = sbr.rel (!%p20_p11) target bundleno = 10 (0xa), region = 101 }
  0x9f   :  { %329 = vsyncpa [#allocation3], 1 }
  0xa0   :  { %331 = vsyncpa [#allocation3 + $0x1], 1 }
  0xa1   :  { %332 = vsyncpa [#allocation8], 1 }
  0xa2   :  { %334 = vsyncpa [#allocation8 + $0x1], 1 }
  0xa3   :  { %335 = vsyncpa [#allocation4], 1 }
  0xa4   :  { %337 = vsyncpa [#allocation4 + $0x1], 1 }
  0xa5   :  { %338 = vsyncpa [#allocation5], 1 }
  0xa6   :  { %340 = vsyncpa [#allocation5 + $0x1], 1 }

</bundles_post_ra>
